<compile_context>
chip_gen: v6e
topology: v6e:2x2x1
jax: 0.10.0
libtpu: 0.0.40
codegen_flags: <defaults>
</compile_context>

<pallas_src>
import jax
import jax.numpy as jnp
from jax.experimental import pallas as pl
from jax.experimental.pallas import tpu as pltpu


def _round_up(x, m):
    return (x + m - 1) // m * m


def _pick_tile(full, tile_max, align):
    """Choose (tile, padded_full).

    Full-extent block (no padding, allowed regardless of alignment) when it fits;
    otherwise the smallest aligned tile that covers `full` in ceil(full/tile_max)
    steps, minimizing zero padding.  `tile_max` must be a multiple of `align`.
    """
    if full <= tile_max:
        return full, full
    n_tiles = -(-full // tile_max)
    tile = _round_up(-(-full // n_tiles), align)
    return tile, tile * n_tiles


def _conv2dmod_matmul_kernel(p_ref, w_ref, o_ref, acc_ref):
    """Tiled GEMM body.

    p_ref:   (TM, TK)  bf16 im2col patch tile (batch dim squeezed)
    w_ref:   (TK, TN)  bf16 demodulated weight tile (lane-dense Cout)
    o_ref:   (TM, TN)  f32 output tile
    acc_ref: (TM, TN)  f32 VMEM accumulator, carried across the kkc axis
    """
    k = pl.program_id(3)

    @pl.when(k == 0)
    def _init():
        acc_ref[...] = jnp.zeros_like(acc_ref)

    acc_ref[...] += jnp.dot(p_ref[...], w_ref[...],
                            preferred_element_type=jnp.float32)

    @pl.when(k == pl.num_programs(3) - 1)
    def _store():
        o_ref[...] = acc_ref[...].astype(o_ref.dtype)


def conv2d_mod(x_nchw, weight_oihw, *, stride=1, dilation=1, groups=1,
               demod=True, eps=1e-8, tm_max=512, tk_max=1024):
    """Forward pass of Conv2DMod. x_nchw: (B, Cin, H, W); weight: (Cout, Cin, K, K)."""
    assert groups == 1  # TODO(synk): grouped conv not implemented in the Pallas kernel
    B, Cin, H, W = x_nchw.shape
    Cout, Cin_w, K, K2 = weight_oihw.shape
    assert K == K2 and Cin_w == Cin

    # Same-padding formula from the module (conv2d itself runs stride=1, dilation=1).
    pad = ((H - 1) * (stride - 1) + dilation * (K - 1)) // 2
    Hout = H + 2 * pad - (K - 1)
    Wout = W + 2 * pad - (K - 1)

    # ---- weight preprocessing (hoisted out of the kernel) -------------------
    w = weight_oihw.astype(jnp.float32)
    if demod:
        d = jax.lax.rsqrt(jnp.sum(w * w, axis=(1, 2, 3), keepdims=True) + eps)
        w = w * d
    # OIHW -> (kh, kw, cin, cout) -> (K*K*Cin, Cout); matches patch tap order below.
    w2d = jnp.transpose(w, (2, 3, 1, 0)).reshape(K * K * Cin, Cout)

    # ---- tile derivation (conservative: fits v7x's 64 MiB VMEM easily) ------
    tn = 256 if Cout >= 256 else 128           # 256-wide N tile feeds v6e/v7x 2x256 MXU
    cout_p = _round_up(Cout, tn)
    M = Hout * Wout
    KKC = K * K * Cin
    tm, m_p = _pick_tile(M, tm_max, 8)         # sublane-aligned M tile
    tk, kkc_p = _pick_tile(KKC, tk_max, 128)   # lane-aligned contraction tile

    # bf16 MXU operands; zero-pad Cout (lane-dense stores) and, if tiled, kkc.
    w2d = jnp.pad(w2d, ((0, kkc_p - KKC), (0, cout_p - Cout))).astype(jnp.bfloat16)

    # ---- im2col (wrapper-side layout plumbing) -------------------------------
    x_nhwc = jnp.transpose(x_nchw, (0, 2, 3, 1)).astype(jnp.bfloat16)
    x_pad = jnp.pad(x_nhwc, ((0, 0), (pad, pad), (pad, pad), (0, 0)))
    taps = [x_pad[:, kh:kh + Hout, kw:kw + Wout, :]
            for kh in range(K) for kw in range(K)]            # (kh, kw) major order
    patches = jnp.concatenate(taps, axis=-1)                  # (B, Hout, Wout, K*K*Cin)
    patches = patches.reshape(B, M, KKC)
    patches = jnp.pad(patches, ((0, 0), (0, m_p - M), (0, kkc_p - KKC)))

    n_j = cout_p // tn
    n_i = m_p // tm
    n_k = kkc_p // tk

    # VMEM budget: double-buffered bf16 operands + f32 accumulator + f32 out bufs.
    vmem_need = 2 * tm * tk * 2 + 2 * tk * tn * 2 + tm * tn * 4 + 2 * tm * tn * 4
    vmem_limit = int(min(64 * 2**20, max(4 * vmem_need, 32 * 2**20)))

    cost = pl.CostEstimate(
        flops=2 * B * m_p * kkc_p * cout_p,
        transcendentals=0,
        bytes_accessed=int(patches.size * 2 + w2d.size * 2 + B * m_p * cout_p * 4),
    )

    out_p = pl.pallas_call(
        _conv2dmod_matmul_kernel,
        out_shape=jax.ShapeDtypeStruct((B, m_p, cout_p), jnp.float32),
        grid_spec=pltpu.PrefetchScalarGridSpec(
            num_scalar_prefetch=0,
            # cout outer, hw inner, kkc innermost: weight tile stays resident across
            # hw steps when n_k == 1; kkc is the reduction axis (accumulator carried).
            grid=(B, n_j, n_i, n_k),
            in_specs=[
                pl.BlockSpec((None, tm, tk), lambda b, j, i, k: (b, i, k)),
                pl.BlockSpec((tk, tn), lambda b, j, i, k: (k, j)),
            ],
            out_specs=pl.BlockSpec((None, tm, tn), lambda b, j, i, k: (b, i, j)),
            scratch_shapes=[pltpu.VMEM((tm, tn), jnp.float32)],
        ),
        compiler_params=pltpu.CompilerParams(
            dimension_semantics=("parallel", "parallel", "parallel", "arbitrary"),
            vmem_limit_bytes=vmem_limit),
        cost_estimate=cost,
    )(patches, w2d)

    # Un-pad, restore NCHW (wrapper-side, fused by XLA).
    out = out_p[:, :M, :Cout].reshape(B, Hout, Wout, Cout)
    return jnp.transpose(out, (0, 3, 1, 2)).astype(x_nchw.dtype)


def _reference(x_nchw, weight_oihw, *, demod=True, eps=1e-8, stride=1, dilation=1):
    """Pure-JAX f32 reference matching F.conv2d semantics (NCHW / OIHW)."""
    w = weight_oihw
    if demod:
        d = jax.lax.rsqrt(jnp.sum(w * w, axis=(1, 2, 3), keepdims=True) + eps)
        w = w * d
    K = weight_oihw.shape[-1]
    H = x_nchw.shape[2]
    pad = ((H - 1) * (stride - 1) + dilation * (K - 1)) // 2
    return jax.lax.conv_general_dilated(
        x_nchw, w, window_strides=(1, 1), padding=[(pad, pad), (pad, pad)],
        dimension_numbers=("NCHW", "OIHW", "NCHW"))


if __name__ == "__main__":
    key = jax.random.PRNGKey(0)

    # --- small shapes consistent with the module -----------------------------
    B, Cin, H, W = 2, 4, 16, 16
    Cout, K = 8, 3
    kx, kw, key = jax.random.split(key, 3)
    x = jax.random.normal(kx, (B, Cin, H, W), dtype=jnp.float32)
    weight = jax.random.normal(kw, (Cout, Cin, K, K), dtype=jnp.float32)

    out = jax.block_until_ready(conv2d_mod(x, weight, demod=True, eps=1e-8))
    ref = _reference(x, weight, demod=True, eps=1e-8)
    assert out.shape == ref.shape == (B, Cout, H, W), (out.shape, ref.shape)
    # bf16 MXU operands (f32 accumulation) -> loosened tolerance vs the f32 reference.
    assert jnp.allclose(out, ref, atol=5e-2, rtol=5e-2), \
        float(jnp.max(jnp.abs(out - ref)))

    # --- slightly larger case exercising the hw/kkc tiling + accumulator path ---
    B2, Cin2, H2, W2, Cout2 = 1, 128, 24, 24, 16
    kx2, kw2, key = jax.random.split(key, 3)
    x2 = jax.random.normal(kx2, (B2, Cin2, H2, W2), dtype=jnp.float32)
    w2 = jax.random.normal(kw2, (Cout2, Cin2, K, K), dtype=jnp.float32)

    out2 = jax.block_until_ready(conv2d_mod(x2, w2, demod=True, eps=1e-8))
    ref2 = _reference(x2, w2, demod=True, eps=1e-8)
    assert out2.shape == ref2.shape == (B2, Cout2, H2, W2), (out2.shape, ref2.shape)
    assert jnp.allclose(out2, ref2, atol=5e-2, rtol=5e-2), \
        float(jnp.max(jnp.abs(out2 - ref2)))

    print("KERNEL_OK")
</pallas_src>

<mosaic_0001>
module attributes {stable_mosaic.version = 11 : i64} {
  func.func @_conv2dmod_matmul_kernel(%arg0: i32, %arg1: i32, %arg2: i32, %arg3: i32, %arg4: memref<1x256x36xbf16, #tpu.memory_space<vmem>>, %arg5: memref<36x128xbf16, #tpu.memory_space<vmem>>, %arg6: memref<1x256x128xf32, #tpu.memory_space<vmem>>, %arg7: memref<256x128xf32, #tpu.memory_space<vmem>>) attributes {dimension_semantics = [#tpu.dimension_semantics<parallel>, #tpu.dimension_semantics<parallel>, #tpu.dimension_semantics<parallel>, #tpu.dimension_semantics<arbitrary>], iteration_bounds = array<i64: 2, 1, 1, 1>, scalar_prefetch = 0 : i64, scratch_operands = 1 : i64, tpu.core_type = #tpu.core_type<tc>, window_params = [{transform_indices = @transform_0, window_bounds = array<i64: 1, 256, 36>}, {transform_indices = @transform_1, window_bounds = array<i64: 36, 128>}, {transform_indices = @transform_2, window_bounds = array<i64: 1, 256, 128>}]} {
    %c0_i32 = arith.constant 0 : i32
    %0 = arith.cmpi eq, %arg3, %c0_i32 : i32
    %1 = arith.extui %0 : i1 to i32
    %c0_i32_0 = arith.constant 0 : i32
    %2 = arith.cmpi ne, %1, %c0_i32_0 : i32
    scf.if %2 {
      %cst_11 = arith.constant 0.000000e+00 : f32
      %13 = vector.broadcast %cst_11 : f32 to vector<256x128xf32>
      %c0_12 = arith.constant 0 : index
      %c0_13 = arith.constant 0 : index
      %14 = vector.load %arg7[%c0_12, %c0_13] : memref<256x128xf32, #tpu.memory_space<vmem>>, vector<256x128xf32>
      tpu.vector_store %arg7[%c0_12, %c0_13], %13 {strides = array<i32>} : memref<256x128xf32, #tpu.memory_space<vmem>>, vector<256x128xf32>,
    } else {
    }
    %c0 = arith.constant 0 : index
    %c0_1 = arith.constant 0 : index
    %3 = vector.load %arg7[%c0, %c0_1] : memref<256x128xf32, #tpu.memory_space<vmem>>, vector<256x128xf32>
    %c0_2 = arith.constant 0 : index
    %c0_3 = arith.constant 0 : index
    %c0_4 = arith.constant 0 : index
    %4 = vector.load %arg4[%c0_2, %c0_3, %c0_4] : memref<1x256x36xbf16, #tpu.memory_space<vmem>>, vector<1x256x36xbf16>
    %5 = vector.shape_cast %4 : vector<1x256x36xbf16> to vector<256x36xbf16>
    %c0_5 = arith.constant 0 : index
    %c0_6 = arith.constant 0 : index
    %6 = vector.load %arg5[%c0_5, %c0_6] : memref<36x128xbf16, #tpu.memory_space<vmem>>, vector<36x128xbf16>
    %cst = arith.constant dense<0.000000e+00> : vector<256x128xf32>
    %7 = tpu.matmul %5, %6, %cst {dimension_numbers = #tpu.dot_dimension_numbers<[1], [0], [0], [1], [0, 0, 1, 1], [], []>} : vector<256x36xbf16>, vector<36x128xbf16>, vector<256x128xf32> -> vector<256x128xf32>
    %8 = arith.addf %3, %7 : vector<256x128xf32>
    %c0_7 = arith.constant 0 : index
    %c0_8 = arith.constant 0 : index
    %9 = vector.load %arg7[%c0_7, %c0_8] : memref<256x128xf32, #tpu.memory_space<vmem>>, vector<256x128xf32>
    tpu.vector_store %arg7[%c0_7, %c0_8], %8 {strides = array<i32>} : memref<256x128xf32, #tpu.memory_space<vmem>>, vector<256x128xf32>,
    %c0_i32_9 = arith.constant 0 : i32
    %10 = arith.cmpi eq, %arg3, %c0_i32_9 : i32
    %11 = arith.extui %10 : i1 to i32
    %c0_i32_10 = arith.constant 0 : i32
    %12 = arith.cmpi ne, %11, %c0_i32_10 : i32
    scf.if %12 {
      %c0_11 = arith.constant 0 : index
      %c0_12 = arith.constant 0 : index
      %13 = vector.load %arg7[%c0_11, %c0_12] : memref<256x128xf32, #tpu.memory_space<vmem>>, vector<256x128xf32>
      %c0_13 = arith.constant 0 : index
      %c0_14 = arith.constant 0 : index
      %c0_15 = arith.constant 0 : index
      %14 = vector.load %arg6[%c0_13, %c0_14, %c0_15] : memref<1x256x128xf32, #tpu.memory_space<vmem>>, vector<1x256x128xf32>
      %15 = vector.shape_cast %14 : vector<1x256x128xf32> to vector<256x128xf32>
      %16 = vector.shape_cast %13 : vector<256x128xf32> to vector<1x256x128xf32>
      tpu.vector_store %arg6[%c0_13, %c0_14, %c0_15], %16 {strides = array<i32>} : memref<1x256x128xf32, #tpu.memory_space<vmem>>, vector<1x256x128xf32>,
    } else {
    }
    return
  }
  func.func @transform_0(%arg0: i32, %arg1: i32, %arg2: i32, %arg3: i32) -> (i32, i32, i32) {
    %c0_i32 = arith.constant 0 : i32
    return %arg0, %arg2, %arg3 : i32, i32, i32
  }
  func.func @transform_1(%arg0: i32, %arg1: i32, %arg2: i32, %arg3: i32) -> (i32, i32) {
    %c0_i32 = arith.constant 0 : i32
    return %arg3, %arg1 : i32, i32
  }
  func.func @transform_2(%arg0: i32, %arg1: i32, %arg2: i32, %arg3: i32) -> (i32, i32, i32) {
    %c0_i32 = arith.constant 0 : i32
    return %arg0, %arg2, %arg1 : i32, i32, i32
  }
}

</mosaic_0001>

<bundles_post_ra>
// kernel: tpu_custom_call.1
= control target key start
LH: loop header
LB: loop body
LE: loop exit
PB: predicated region body
PF: predicated region fallthrough
CT: control target
= control target key end

     0   :  { %7 = vsyncpa [#allocation4], 0  ;;  %s1387_s0 = inlined_call_operand.vmem [shape: bf16[2,256,36], index: 0, kind: input, shape index: {}]   ;;  %s1388_s1 = inlined_call_operand.vmem [shape: bf16[36,128], index: 1, kind: input, shape index: {}]   ;;  %s1389_s2 = inlined_call_operand.hbm [shape: f32[2,256,128], index: 2, kind: output, shape index: {}]  }
   0x1   :  { %9 = vsyncpa [#allocation4 + $0x1], 0  ;;  %s1191_s9 = smov 0   ;;  %s1193_s10 = smov 0  }
   0x2   :  { %s1195_s11 = smov 0   ;;  %s1197_s12 = smov 0  }
   0x3   :  { %s1199_s13 = smov 0   ;;  %s1201_s14 = smov 0  }
   0x4 LB: > { %s903_s15 = sadd.s32 4294967295, %s1171_s14   ;;  %s904_s16 = sadd.s32 4294967294, %s1171_s14   ;;  %s1171_s14 = sphi %s1201_s14, %s15_s14   ;;  %s1167_s13 = sphi %s1199_s13, %s1396_s13   ;;  %s1163_s12 = sphi %s1197_s12, %s1395_s12   ;;  %s1159_s11 = sphi %s1195_s11, %s1394_s11   ;;  %s1155_s10 = sphi %s1193_s10, %s1393_s10   ;;  %s1151_s9 = sphi %s1191_s9, %s1392_s9  }
   0x5   : > { %s41_s17 = sadd.s32 1, %s1167_s13  ;;  %s110_s18 = sadd.s32 1, %s1159_s11 }
   0x6   : > { %p43_p0 = scmp.ge.s32.totalorder %s41_s17, 2  ;;  %p120_p1 = scmp.ne.s32.totalorder %s1159_s11, %s1155_s10 }
   0x7   : > { %p121_p2 = scmp.eq.s32.totalorder %s903_s15, 1  ;;  %p126_p3 = scmp.ne.s32.totalorder %s1155_s10, %s1151_s9 }
   0x8   : > { %s1398_s17 = smov (%p43_p0, %s41_s17), 0  ;;  %p127_p5 = scmp.eq.s32.totalorder %s904_s16, 1 }
   0x9   : > { %p1231_p4 = por %p121_p2, %p120_p1  ;;  %s103_s20 = ssub.s32 %s1167_s13, %s1398_s17 }
   0xa   : > { %p908_p6 = scmp.ge.s32.totalorder %s1171_s14, 1  ;;  %p108_p7 = scmp.eq.s32.totalorder %s103_s20, 0 }
   0xb   : > { %p1238_p8 = por %p127_p5, %p126_p3  ;;  %p173_p9 = scmp.lt.s32.totalorder %s1171_s14, 3 }
   0xc   : > { %s1244_s22 = scalar_select %p108_p7, %s1159_s11, %s110_s18  }
   0xd   : > { %p174_p10 = pnand %p908_p6, %p173_p9 }
   0xe   : > { %p211_p11 = scmp.lt.s32.totalorder (!%p174_p10), %s1163_s12, 1  ;;  %s207_s6 = sand.u32 (!%p174_p10), 1, %s1155_s10  }
   0xf   : > { %177 = sbr.rel (%p174_p10) target bundleno = 270 (0x10e), region = 28  ;;  %s909_s7 = sshll.u32 (!%p174_p10), %s207_s6, 8 }
  0x10   : > { %s1297_s8 = scalar_lea.vmem (!%p174_p10), [#allocation3], %s909_s7  ;;  %s953_s15 = sshll.u32 (!%p174_p10), %s1163_s12, 12 }
  0x11   : > { %s796_s16 = sshll.u32 (!%p174_p10), %s1297_s8, 4  ;;  %s1332_s23 = scalar_lea.hbm (!%p174_p10), %s1389_s2, %s953_s15  ;;  %s1334_s16 = int_to_ptr.vmem [resolvable:$true] %s796_s16 }
  0x12   : > { %s1095_s24 = scalar_lea.vmem (!%p174_p10), %s1334_s16, 4096  ;;  %s1173_s25 = smov (!%p174_p10), [#allocation3]  }
  0x13   : > { %p1096_p12 = scmp.ne.s32.totalorder (!%p174_p10), %s1334_s16, %s1095_s24  ;;  %s1099_s26 = sshll.u32 (!%p174_p10), %s1173_s25, 4  ;;  %s1100_s26 = int_to_ptr.vmem [resolvable:$false] %s1099_s26 }
  0x14   : > { %v1076_v0 = vld [vmem:[%s1388_s1 + $0x10] ss:$0 sps:$4 sm:$0x33]   ;;  %vm483_vm0 = vcmask 1041408   ;;  %v1077_v1 = vld [vmem:[%s1388_s1 + $0x8] sm:$0xff]   ;;  %s212_s27 = scalar_select %p211_p11, %s1163_s12, 1 }
  0x15   : > { %1017 = vmatprep.subr.msk.bf16.mxu0 %vm483_vm0, %v1076_v0  ;;  %1018 = vmatprep.subr.msk.bf16.mxu1 %vm483_vm0, %v1076_v0  ;;  %v485_v2 = vsel %vm483_vm0, %v1076_v0, 0  ;;  %v1078_v3 = vld [vmem:[%s1388_s1] sm:$0xff]   ;;  %vm434_vm1 = vcmask 293888   ;;  %s1342_s12 = scalar_lea.sflag [#allocation4], %s207_s6  ;;  %p1097_p13 = pnand %p1096_p12, %p1231_p4 }
  0x16   : > { %974 = vmatpush3.bf16.msra.mxu0 %v485_v2  ;;  %1014 = vmatpush3.bf16.msra.mxu1 %v485_v2  ;;  %s952_s30 = sshll.u32 %s212_s27, 7  ;;  %s1101_s27 = scalar_lea.vmem %s1100_s26, 8192 }
  0x17   : > { %975 = vmatprep.subr.bf16.mxu0 %v1077_v1  ;;  %1012 = vmatprep.subr.bf16.mxu1 %v1077_v1  ;;  %s1260_s5 = scalar_lea.vmem %s1387_s0, %s952_s30  ;;  %p1098_p0 = pneg %p1097_p13 }
  0x18   : > { %v1079_v4 = vld [vmem:[%s1260_s5] sm:$0xff]   ;;  %v1081_v6 = vld [vmem:[%s1260_s5 + $0x8] sm:$0xff]   ;;  %v1083_v8 = vld [vmem:[%s1260_s5 + $0x10] sm:$0xff]   ;;  %p1102_p1 = scmp.lt.s32.totalorder %s1334_s16, %s1100_s26  ;;  %p1103_p2 = scmp.lt.s32.totalorder %s1101_s27, %s1095_s24 }
  0x19   : > { %v1080_v5 = vld [vmem:[%s1260_s5 + $0x40] sm:$0xff]   ;;  %979 = vmatprep.mubr.msk.bf16.mxu0 %vm434_vm1, %v1079_v4  ;;  %v1082_v7 = vld [vmem:[%s1260_s5 + $0x48] sm:$0xff]   ;;  %v1084_v9 = vld [vmem:[%s1260_s5 + $0x50] sm:$0xff]  }
  0x1a   : > { %976 = vmatpush3.bf16.msra.mxu0 %v1077_v1  ;;  %1015 = vmatpush3.bf16.msra.mxu1 %v1077_v1  ;;  %v1085_v10 = vld [vmem:[%s1260_s5 + $0x18] sm:$0xff]   ;;  %v1087_v12 = vld [vmem:[%s1260_s5 + $0x20] sm:$0xff]   ;;  %v1089_v14 = vld [vmem:[%s1260_s5 + $0x28] sm:$0xff]   ;;  %p1104_p3 = por %p1103_p2, %p1102_p1 }
  0x1b   : > { %977 = vmatprep.subr.bf16.mxu0 %v1078_v3  ;;  %1013 = vmatprep.subr.bf16.mxu1 %v1078_v3  ;;  %v1086_v11 = vld [vmem:[%s1260_s5 + $0x58] sm:$0xff]   ;;  %v1088_v13 = vld [vmem:[%s1260_s5 + $0x60] sm:$0xff]   ;;  %v1090_v15 = vld [vmem:[%s1260_s5 + $0x68] sm:$0xff]  }
  0x1c   : > { %995 = vmatprep.mubr.msk.bf16.mxu1 %vm434_vm1, %v1080_v5  ;;  %v1091_v16 = vld [vmem:[%s1260_s5 + $0x30] sm:$0xff]   ;;  %v1093_v18 = vld [vmem:[%s1260_s5 + $0x38] sm:$0xff]   ;;  %p1105_p5 = pnand %p1104_p3, %p1098_p0 }
  0x1d   : > { %v1092_v17 = vld [vmem:[%s1260_s5 + $0x70] sm:$0xff]   ;;  %v1094_v19 = vld [vmem:[%s1260_s5 + $0x78] sm:$0xff]  }
  0x1e   : > { %978 = vmatpush3.bf16.msra.mxu0 %v1078_v3  ;;  %1016 = vmatpush3.bf16.msra.mxu1 %v1078_v3 }
  0x21   : > { %980 = vmatmul.mubr.msk.bf16.vlgmr.msra.gmra.mxu0 %vm434_vm1, %v1081_v6  ;;  %996 = vmatmul.mubr.msk.bf16.vlgmr.msra.gmra.mxu1 %vm434_vm1, %v1082_v7 }
  0x22   : > { %983 = vmatprep.mubr.msk.bf16.mxu0 %vm434_vm1, %v1083_v8  ;;  %999 = vmatprep.mubr.msk.bf16.mxu1 %vm434_vm1, %v1084_v9 }
  0x29   : > { %984 = vmatmul.mubr.msk.bf16.gmra.mxu0 %vm434_vm1, %v1085_v10  ;;  %1000 = vmatmul.mubr.msk.bf16.gmra.mxu1 %vm434_vm1, %v1086_v11 }
  0x2a   : > { %987 = vmatprep.mubr.msk.bf16.mxu0 %vm434_vm1, %v1087_v12  ;;  %1003 = vmatprep.mubr.msk.bf16.mxu1 %vm434_vm1, %v1088_v13 }
  0x31   : > { %988 = vmatmul.mubr.msk.bf16.gmra.mxu0 %vm434_vm1, %v1089_v14  ;;  %1004 = vmatmul.mubr.msk.bf16.gmra.mxu1 %vm434_vm1, %v1090_v15 }
  0x32   : > { %991 = vmatprep.mubr.msk.bf16.mxu0 %vm434_vm1, %v1091_v16  ;;  %1007 = vmatprep.mubr.msk.bf16.mxu1 %vm434_vm1, %v1092_v17 }
  0x39   : > { %992 = vmatmul.mubr.msk.bf16.gmra.mxu0 %vm434_vm1, %v1093_v18  ;;  %1008 = vmatmul.mubr.msk.bf16.gmra.mxu1 %vm434_vm1, %v1094_v19 }
  0xe1   : > { %v981_v20 = vpop.f32.mrf.mxu0  ;;  %v997_v21 = vpop.f32.mrf.mxu1 }
  0xe2   : > { %749 = vst [vmem:[%s1297_s8 + $0x10] sm:$0xff] %v981_v20  ;;  %765 = vst [vmem:[%s1297_s8 + $0x90] sm:$0xff] %v997_v21 }
  0xe3   : > { %v521_v22 = vpop.f32.mrf.mxu0  ;;  %v585_v23 = vpop.f32.mrf.mxu1 }
  0xe4   : > { %747 = vst [vmem:[%s1297_s8] sm:$0xff] %v521_v22  ;;  %763 = vst [vmem:[%s1297_s8 + $0x80] sm:$0xff] %v585_v23 }
  0xe5   : > { %v982_v24 = vpop.f32.mrf.mxu0  ;;  %v998_v25 = vpop.f32.mrf.mxu1 }
  0xe6   : > { %750 = vst [vmem:[%s1297_s8 + $0x18] sm:$0xff] %v982_v24  ;;  %766 = vst [vmem:[%s1297_s8 + $0x98] sm:$0xff] %v998_v25 }
  0xe7   : > { %v524_v26 = vpop.f32.mrf.mxu0  ;;  %v588_v27 = vpop.f32.mrf.mxu1 }
  0xe8   : > { %748 = vst [vmem:[%s1297_s8 + $0x8] sm:$0xff] %v524_v26  ;;  %764 = vst [vmem:[%s1297_s8 + $0x88] sm:$0xff] %v588_v27 }
  0xe9   : > { %v985_v28 = vpop.f32.mrf.mxu0  ;;  %v1001_v29 = vpop.f32.mrf.mxu1 }
  0xea   : > { %753 = vst [vmem:[%s1297_s8 + $0x30] sm:$0xff] %v985_v28  ;;  %769 = vst [vmem:[%s1297_s8 + $0xb0] sm:$0xff] %v1001_v29 }
  0xeb   : > { %v537_v30 = vpop.f32.mrf.mxu0  ;;  %v601_v31 = vpop.f32.mrf.mxu1 }
  0xec   : > { %751 = vst [vmem:[%s1297_s8 + $0x20] sm:$0xff] %v537_v30  ;;  %767 = vst [vmem:[%s1297_s8 + $0xa0] sm:$0xff] %v601_v31 }
  0xed   : > { %v986_v32 = vpop.f32.mrf.mxu0  ;;  %v1002_v33 = vpop.f32.mrf.mxu1 }
  0xee   : > { %754 = vst [vmem:[%s1297_s8 + $0x38] sm:$0xff] %v986_v32  ;;  %770 = vst [vmem:[%s1297_s8 + $0xb8] sm:$0xff] %v1002_v33 }
  0xef   : > { %v540_v34 = vpop.f32.mrf.mxu0  ;;  %v604_v35 = vpop.f32.mrf.mxu1 }
  0xf0   : > { %752 = vst [vmem:[%s1297_s8 + $0x28] sm:$0xff] %v540_v34  ;;  %768 = vst [vmem:[%s1297_s8 + $0xa8] sm:$0xff] %v604_v35 }
  0xf1   : > { %v989_v36 = vpop.f32.mrf.mxu0  ;;  %v1005_v37 = vpop.f32.mrf.mxu1 }
  0xf2   : > { %757 = vst [vmem:[%s1297_s8 + $0x50] sm:$0xff] %v989_v36  ;;  %773 = vst [vmem:[%s1297_s8 + $0xd0] sm:$0xff] %v1005_v37 }
  0xf3   : > { %v553_v38 = vpop.f32.mrf.mxu0  ;;  %v617_v39 = vpop.f32.mrf.mxu1 }
  0xf4   : > { %755 = vst [vmem:[%s1297_s8 + $0x40] sm:$0xff] %v553_v38  ;;  %771 = vst [vmem:[%s1297_s8 + $0xc0] sm:$0xff] %v617_v39 }
  0xf5   : > { %v990_v40 = vpop.f32.mrf.mxu0  ;;  %v1006_v41 = vpop.f32.mrf.mxu1 }
  0xf6   : > { %758 = vst [vmem:[%s1297_s8 + $0x58] sm:$0xff] %v990_v40  ;;  %774 = vst [vmem:[%s1297_s8 + $0xd8] sm:$0xff] %v1006_v41 }
  0xf7   : > { %v556_v42 = vpop.f32.mrf.mxu0  ;;  %v620_v43 = vpop.f32.mrf.mxu1 }
  0xf8   : > { %756 = vst [vmem:[%s1297_s8 + $0x48] sm:$0xff] %v556_v42  ;;  %772 = vst [vmem:[%s1297_s8 + $0xc8] sm:$0xff] %v620_v43 }
  0xf9   : > { %v993_v44 = vpop.f32.mrf.mxu0  ;;  %v1009_v45 = vpop.f32.mrf.mxu1 }
  0xfa   : > { %761 = vst [vmem:[%s1297_s8 + $0x70] sm:$0xff] %v993_v44  ;;  %777 = vst [vmem:[%s1297_s8 + $0xf0] sm:$0xff] %v1009_v45 }
  0xfb   : > { %v569_v46 = vpop.f32.mrf.mxu0  ;;  %v633_v47 = vpop.f32.mrf.mxu1 }
  0xfc   : > { %759 = vst [vmem:[%s1297_s8 + $0x60] sm:$0xff] %v569_v46  ;;  %775 = vst [vmem:[%s1297_s8 + $0xe0] sm:$0xff] %v633_v47 }
  0xfd   : > { %v994_v48 = vpop.f32.mrf.mxu0  ;;  %v1010_v49 = vpop.f32.mrf.mxu1 }
  0xfe   : > { %762 = vst [vmem:[%s1297_s8 + $0x78] sm:$0xff] %v994_v48  ;;  %778 = vst [vmem:[%s1297_s8 + $0xf8] sm:$0xff] %v1010_v49 }
  0xff   : > { %v572_v50 = vpop.f32.mrf.mxu0  ;;  %v636_v51 = vpop.f32.mrf.mxu1 }
 0x100   : > { %760 = vst [vmem:[%s1297_s8 + $0x68] sm:$0xff] %v572_v50  ;;  %776 = vst [vmem:[%s1297_s8 + $0xe8] sm:$0xff] %v636_v51 }
 0x101   : > { %1108 = shalt.err (!%p1105_p5)
}
 0x102   : > { %s1109_s28 = scalar_lea.hbm %s1332_s23, 4096  ;;  %s1113_s3 = scalar_lea.hbm %s1389_s2, 8192 }
 0x103   : > { %p1110_p6 = scmp.ne.s32.totalorder %s1332_s23, %s1109_s28  ;;  %p1114_p10 = scmp.lt.s32.totalorder %s1332_s23, %s1389_s2 }
 0x104   : > { %p1115_p11 = scmp.lt.s32.totalorder %s1113_s3, %s1109_s28 }
 0x105   : > { %p1111_p7 = pnand %p1110_p6, %p1231_p4 }
 0x106   : > { %p1116_p12 = por %p1115_p11, %p1114_p10 }
 0x107   : > { %p1112_p9 = pneg %p1111_p7 }
 0x109   : > { %p1117_p13 = pnand %p1116_p12, %p1112_p9 }
 0x10b   : > { %1120 = shalt.err (!%p1117_p13)
}
 0x10c   : > { %s1174_s6 = smov 128   ;;  %s1175_s7 = smov 8  }
 0x10d   : > { %1019 = dma.vmem_to_hbm [thread:$0]  (%p1231_p4), %s1334_s16, 4096, %s1332_s23, %s1342_s12, %s1174_s6, %s1174_s6, %s1175_s7  }
 0x10e PF: > { %p1025_p0 = scmp.ge.s32.totalorder %s1171_s14, 2  ;;  %s811_s8 = sand.u32 1, %s1151_s9  }
 0x10f   : > { %s812_s15 = scalar_lea.sflag [#allocation4], %s811_s8 }
 0x110   : > { %p1022_p1 = pnand %p1025_p0, %p1238_p8 }
 0x112   : > { %p1023_p2 = pneg %p1022_p1 }
 0x114   : > { %1146 = dma.done.wait (%p1023_p2), %s812_s15, 4096  }
 0x115   : > { %1148 = vsyncadd (%p1023_p2), %s812_s15, 4294963200  ;;  %s15_s14 = sadd.s32 1, %s1171_s14   ;;  %s1392_s9 = smov %s1155_s10 }
 0x116   : > { %p12_p3 = scmp.ge.s32.totalorder %s15_s14, 4   ;;  %s1393_s10 = smov %s1159_s11 }
 0x117   : > { %s1394_s11 = smov %s1244_s22  ;;  %s1395_s12 = smov %s1167_s13 }
 0x118   : > { %s1396_s13 = smov %s1398_s17  ;;  %14 = sbr.rel (!%p12_p3) target bundleno = 4 (0x4), region = 74 }
 0x11d   :  { %817 = vsyncpa [#allocation4], 1 }
 0x11e   :  { %819 = vsyncpa [#allocation4 + $0x1], 1 }

</bundles_post_ra>
